<compile_context>
chip_gen: v7x
topology: tpu7x:2x2x1
jax: 0.10.0
libtpu: 0.0.40
codegen_flags: <defaults>
</compile_context>

<pallas_src>
import functools

import jax
import jax.numpy as jnp
from jax.experimental import pallas as pl
from jax.experimental.pallas import tpu as pltpu

LANE = 128  # TPU lane width


def _round_up(x, m):
    return ((x + m - 1) // m) * m


def _actor_kernel(s_ref, w1_ref, b1_ref, w2_ref, b2_ref, w3_ref, b3_ref, o_ref,
                  *, max_action):
    # Layer 1: bf16 MXU matmul, f32 accumulation; bias + ReLU kept in f32.
    h1 = jnp.dot(s_ref[...], w1_ref[...], preferred_element_type=jnp.float32)
    h1 = jnp.maximum(h1 + b1_ref[...], 0.0)

    # Layer 2: downcast activation to bf16 only at the MXU boundary.
    h2 = jnp.dot(h1.astype(jnp.bfloat16), w2_ref[...],
                 preferred_element_type=jnp.float32)
    h2 = jnp.maximum(h2 + b2_ref[...], 0.0)

    # Layer 3: lane-dense (128-wide, zero-padded) output; tanh on the EUP.
    h3 = jnp.dot(h2.astype(jnp.bfloat16), w3_ref[...],
                 preferred_element_type=jnp.float32)
    o_ref[...] = (max_action * jnp.tanh(h3 + b3_ref[...])).astype(o_ref.dtype)


def init_actor_params(key, state_dim, action_dim, hidden_sizes=(128, 128)):
    """f32 params mirroring nn.Linear default init U(-1/sqrt(fan_in), 1/sqrt(fan_in)).
    Weights stored as (in_features, out_features); biases as (1, out_features)."""
    dims = [state_dim, hidden_sizes[0], hidden_sizes[1], action_dim]
    params = {}
    for i in range(3):
        key, kw, kb = jax.random.split(key, 3)
        fan_in, fan_out = dims[i], dims[i + 1]
        bound = 1.0 / jnp.sqrt(jnp.float32(fan_in))
        params[f"w{i+1}"] = jax.random.uniform(
            kw, (fan_in, fan_out), jnp.float32, -bound, bound)
        params[f"b{i+1}"] = jax.random.uniform(
            kb, (1, fan_out), jnp.float32, -bound, bound)
    return params


def prepare_actor_params(params):
    """Kernel-side params: zero-pad layer-1 K and layer-3 N to the lane width,
    cast weights to bf16 for the MXU; biases stay f32 (added to f32 accumulators)."""
    state_dim = params["w1"].shape[0]
    action_dim = params["w3"].shape[1]
    k_pad = _round_up(state_dim, LANE)
    n_pad = _round_up(action_dim, LANE)
    prepared = {
        "w1": jnp.pad(params["w1"], ((0, k_pad - state_dim), (0, 0))).astype(jnp.bfloat16),
        "b1": params["b1"].astype(jnp.float32),
        "w2": params["w2"].astype(jnp.bfloat16),
        "b2": params["b2"].astype(jnp.float32),
        "w3": jnp.pad(params["w3"], ((0, 0), (0, n_pad - action_dim))).astype(jnp.bfloat16),
        "b3": jnp.pad(params["b3"], ((0, 0), (0, n_pad - action_dim))).astype(jnp.float32),
    }
    return prepared, action_dim


def actor_forward(state, prepared, max_action, action_dim, block_b=512):
    """state: (B, state_dim) f32. prepared: output of prepare_actor_params."""
    B, state_dim = state.shape
    k_full = prepared["w1"].shape[0]
    h1_dim = prepared["w1"].shape[1]
    h2_dim = prepared["w2"].shape[1]
    n_full = prepared["w3"].shape[1]

    # Batch tile: multiple of 16 (bf16 sublane packing); pad B up to the tile grid.
    tb = min(block_b, _round_up(B, 16))
    b_pad = _round_up(B, tb)
    s = jnp.pad(state.astype(jnp.bfloat16),
                ((0, b_pad - B), (0, k_full - state_dim)))

    grid = (b_pad // tb,)

    def resident(shape):  # full-array block, constant index_map -> stays in VMEM
        return pl.BlockSpec(shape, lambda i: (0, 0))

    flops = 2 * b_pad * (k_full * h1_dim + h1_dim * h2_dim + h2_dim * n_full)
    bytes_accessed = (
        s.size * 2
        + sum(int(v.size) * v.dtype.itemsize for v in prepared.values())
        + b_pad * n_full * 4)
    cost = pl.CostEstimate(flops=int(flops),
                           transcendentals=int(b_pad * n_full),
                           bytes_accessed=int(bytes_accessed))

    out = pl.pallas_call(
        functools.partial(_actor_kernel, max_action=float(max_action)),
        out_shape=jax.ShapeDtypeStruct((b_pad, n_full), jnp.float32),
        grid=grid,
        in_specs=[
            pl.BlockSpec((tb, k_full), lambda i: (i, 0)),   # state tile (pipelined)
            resident((k_full, h1_dim)),                     # w1
            resident((1, h1_dim)),                          # b1
            resident((h1_dim, h2_dim)),                     # w2
            resident((1, h2_dim)),                          # b2
            resident((h2_dim, n_full)),                     # w3
            resident((1, n_full)),                          # b3
        ],
        out_specs=pl.BlockSpec((tb, n_full), lambda i: (i, 0)),
        compiler_params=pltpu.CompilerParams(
            dimension_semantics=("parallel",)),
        cost_estimate=cost,
    )(s, prepared["w1"], prepared["b1"], prepared["w2"], prepared["b2"],
      prepared["w3"], prepared["b3"])

    return out[:B, :action_dim]


def actor_forward_ref(state, params, max_action):
    a = jnp.maximum(state @ params["w1"] + params["b1"], 0.0)
    a = jnp.maximum(a @ params["w2"] + params["b2"], 0.0)
    return max_action * jnp.tanh(a @ params["w3"] + params["b3"])


if __name__ == "__main__":
    key = jax.random.PRNGKey(0)
    key, k_state = jax.random.split(key)

    batch = 2
    state_dim = 16
    action_dim = 8
    max_action = 2.0
    hidden_sizes = (128, 128)

    params = init_actor_params(key, state_dim, action_dim, hidden_sizes)
    state = jax.random.normal(k_state, (batch, state_dim), jnp.float32)

    prepared, act_dim = prepare_actor_params(params)
    out = actor_forward(state, prepared, max_action, act_dim)
    out = jax.block_until_ready(out)

    ref = actor_forward_ref(state, params, max_action)
    assert out.shape == (batch, action_dim)
    # bf16 MXU inputs vs f32 reference -> loosened tolerance.
    assert jnp.allclose(out, ref, atol=5e-2, rtol=5e-2), float(jnp.max(jnp.abs(out - ref)))

    print("KERNEL_OK")
</pallas_src>

<mosaic_0001>
module attributes {stable_mosaic.version = 11 : i64} {
  func.func @_actor_kernel(%arg0: i32, %arg1: memref<16x128xbf16, #tpu.memory_space<vmem>>, %arg2: memref<128x128xbf16, #tpu.memory_space<vmem>>, %arg3: memref<1x128xf32, #tpu.memory_space<vmem>>, %arg4: memref<128x128xbf16, #tpu.memory_space<vmem>>, %arg5: memref<1x128xf32, #tpu.memory_space<vmem>>, %arg6: memref<128x128xbf16, #tpu.memory_space<vmem>>, %arg7: memref<1x128xf32, #tpu.memory_space<vmem>>, %arg8: memref<16x128xf32, #tpu.memory_space<vmem>>) attributes {dimension_semantics = [#tpu.dimension_semantics<parallel>], iteration_bounds = array<i64: 1>, scalar_prefetch = 0 : i64, scratch_operands = 0 : i64, tpu.core_type = #tpu.core_type<tc>, window_params = [{transform_indices = @transform_0, window_bounds = array<i64: 16, 128>}, {pipeline_mode = #tpu.pipeline_mode<synchronous>, transform_indices = @transform_1, window_bounds = array<i64: 128, 128>}, {pipeline_mode = #tpu.pipeline_mode<synchronous>, transform_indices = @transform_2, window_bounds = array<i64: 1, 128>}, {pipeline_mode = #tpu.pipeline_mode<synchronous>, transform_indices = @transform_3, window_bounds = array<i64: 128, 128>}, {pipeline_mode = #tpu.pipeline_mode<synchronous>, transform_indices = @transform_4, window_bounds = array<i64: 1, 128>}, {pipeline_mode = #tpu.pipeline_mode<synchronous>, transform_indices = @transform_5, window_bounds = array<i64: 128, 128>}, {pipeline_mode = #tpu.pipeline_mode<synchronous>, transform_indices = @transform_6, window_bounds = array<i64: 1, 128>}, {transform_indices = @transform_7, window_bounds = array<i64: 16, 128>}]} {
    %c0 = arith.constant 0 : index
    %c0_0 = arith.constant 0 : index
    %0 = vector.load %arg1[%c0, %c0_0] : memref<16x128xbf16, #tpu.memory_space<vmem>>, vector<16x128xbf16>
    %c0_1 = arith.constant 0 : index
    %c0_2 = arith.constant 0 : index
    %1 = vector.load %arg2[%c0_1, %c0_2] : memref<128x128xbf16, #tpu.memory_space<vmem>>, vector<128x128xbf16>
    %cst = arith.constant dense<0.000000e+00> : vector<16x128xf32>
    %2 = tpu.matmul %0, %1, %cst {dimension_numbers = #tpu.dot_dimension_numbers<[1], [0], [0], [1], [0, 0, 1, 1], [], []>} : vector<16x128xbf16>, vector<128x128xbf16>, vector<16x128xf32> -> vector<16x128xf32>
    %c0_3 = arith.constant 0 : index
    %c0_4 = arith.constant 0 : index
    %3 = vector.load %arg3[%c0_3, %c0_4] : memref<1x128xf32, #tpu.memory_space<vmem>>, vector<1x128xf32>
    %4 = vector.broadcast %3 : vector<1x128xf32> to vector<16x128xf32>
    %5 = arith.addf %2, %4 : vector<16x128xf32>
    %cst_5 = arith.constant 0.000000e+00 : f32
    %6 = vector.broadcast %cst_5 : f32 to vector<16x128xf32>
    %7 = arith.maximumf %5, %6 : vector<16x128xf32>
    %8 = arith.truncf %7 : vector<16x128xf32> to vector<16x128xbf16>
    %c0_6 = arith.constant 0 : index
    %c0_7 = arith.constant 0 : index
    %9 = vector.load %arg4[%c0_6, %c0_7] : memref<128x128xbf16, #tpu.memory_space<vmem>>, vector<128x128xbf16>
    %cst_8 = arith.constant dense<0.000000e+00> : vector<16x128xf32>
    %10 = tpu.matmul %8, %9, %cst_8 {dimension_numbers = #tpu.dot_dimension_numbers<[1], [0], [0], [1], [0, 0, 1, 1], [], []>} : vector<16x128xbf16>, vector<128x128xbf16>, vector<16x128xf32> -> vector<16x128xf32>
    %c0_9 = arith.constant 0 : index
    %c0_10 = arith.constant 0 : index
    %11 = vector.load %arg5[%c0_9, %c0_10] : memref<1x128xf32, #tpu.memory_space<vmem>>, vector<1x128xf32>
    %12 = vector.broadcast %11 : vector<1x128xf32> to vector<16x128xf32>
    %13 = arith.addf %10, %12 : vector<16x128xf32>
    %cst_11 = arith.constant 0.000000e+00 : f32
    %14 = vector.broadcast %cst_11 : f32 to vector<16x128xf32>
    %15 = arith.maximumf %13, %14 : vector<16x128xf32>
    %16 = arith.truncf %15 : vector<16x128xf32> to vector<16x128xbf16>
    %c0_12 = arith.constant 0 : index
    %c0_13 = arith.constant 0 : index
    %17 = vector.load %arg6[%c0_12, %c0_13] : memref<128x128xbf16, #tpu.memory_space<vmem>>, vector<128x128xbf16>
    %cst_14 = arith.constant dense<0.000000e+00> : vector<16x128xf32>
    %18 = tpu.matmul %16, %17, %cst_14 {dimension_numbers = #tpu.dot_dimension_numbers<[1], [0], [0], [1], [0, 0, 1, 1], [], []>} : vector<16x128xbf16>, vector<128x128xbf16>, vector<16x128xf32> -> vector<16x128xf32>
    %c0_15 = arith.constant 0 : index
    %c0_16 = arith.constant 0 : index
    %19 = vector.load %arg7[%c0_15, %c0_16] : memref<1x128xf32, #tpu.memory_space<vmem>>, vector<1x128xf32>
    %20 = vector.broadcast %19 : vector<1x128xf32> to vector<16x128xf32>
    %21 = arith.addf %18, %20 : vector<16x128xf32>
    %22 = math.tanh %21 : vector<16x128xf32>
    %cst_17 = arith.constant 2.000000e+00 : f32
    %23 = vector.broadcast %cst_17 : f32 to vector<16x128xf32>
    %24 = arith.mulf %23, %22 : vector<16x128xf32>
    %c0_18 = arith.constant 0 : index
    %c0_19 = arith.constant 0 : index
    %25 = vector.load %arg8[%c0_18, %c0_19] : memref<16x128xf32, #tpu.memory_space<vmem>>, vector<16x128xf32>
    tpu.vector_store %arg8[%c0_18, %c0_19], %24 {strides = array<i32>} : memref<16x128xf32, #tpu.memory_space<vmem>>, vector<16x128xf32>,
    return
  }
  func.func @transform_0(%arg0: i32) -> (i32, i32) {
    %c0_i32 = arith.constant 0 : i32
    %c0_i32_0 = arith.constant 0 : i32
    return %arg0, %c0_i32 : i32, i32
  }
  func.func @transform_1(%arg0: i32) -> (i32, i32) {
    %c0_i32 = arith.constant 0 : i32
    %c0_i32_0 = arith.constant 0 : i32
    %c0_i32_1 = arith.constant 0 : i32
    return %c0_i32, %c0_i32_0 : i32, i32
  }
  func.func @transform_2(%arg0: i32) -> (i32, i32) {
    %c0_i32 = arith.constant 0 : i32
    %c0_i32_0 = arith.constant 0 : i32
    %c0_i32_1 = arith.constant 0 : i32
    return %c0_i32, %c0_i32_0 : i32, i32
  }
  func.func @transform_3(%arg0: i32) -> (i32, i32) {
    %c0_i32 = arith.constant 0 : i32
    %c0_i32_0 = arith.constant 0 : i32
    %c0_i32_1 = arith.constant 0 : i32
    return %c0_i32, %c0_i32_0 : i32, i32
  }
  func.func @transform_4(%arg0: i32) -> (i32, i32) {
    %c0_i32 = arith.constant 0 : i32
    %c0_i32_0 = arith.constant 0 : i32
    %c0_i32_1 = arith.constant 0 : i32
    return %c0_i32, %c0_i32_0 : i32, i32
  }
  func.func @transform_5(%arg0: i32) -> (i32, i32) {
    %c0_i32 = arith.constant 0 : i32
    %c0_i32_0 = arith.constant 0 : i32
    %c0_i32_1 = arith.constant 0 : i32
    return %c0_i32, %c0_i32_0 : i32, i32
  }
  func.func @transform_6(%arg0: i32) -> (i32, i32) {
    %c0_i32 = arith.constant 0 : i32
    %c0_i32_0 = arith.constant 0 : i32
    %c0_i32_1 = arith.constant 0 : i32
    return %c0_i32, %c0_i32_0 : i32, i32
  }
  func.func @transform_7(%arg0: i32) -> (i32, i32) {
    %c0_i32 = arith.constant 0 : i32
    %c0_i32_0 = arith.constant 0 : i32
    return %arg0, %c0_i32 : i32, i32
  }
}

</mosaic_0001>

<bundles_post_ra>
// kernel: tpu_custom_call.1
= control target key start
LH: loop header
LB: loop body
LE: loop exit
PB: predicated region body
PF: predicated region fallthrough
CT: control target
= control target key end

     0   :  { %12 = vsyncpa [#allocation3], 0  ;;  %s907_s0 = inlined_call_operand.hbm [shape: bf16[16,128], index: 0, kind: input, shape index: {}]   ;;  %s908_s1 = inlined_call_operand.hbm [shape: bf16[128,128], index: 1, kind: input, shape index: {}]   ;;  %s909_s2 = inlined_call_operand.vmem [shape: f32[1,128], index: 2, kind: input, shape index: {}]   ;;  %s910_s3 = inlined_call_operand.hbm [shape: bf16[128,128], index: 3, kind: input, shape index: {}]   ;;  %s911_s4 = inlined_call_operand.vmem [shape: f32[1,128], index: 4, kind: input, shape index: {}]   ;;  %s912_s5 = inlined_call_operand.hbm [shape: bf16[128,128], index: 5, kind: input, shape index: {}]   ;;  %s913_s6 = inlined_call_operand.vmem [shape: f32[1,128], index: 6, kind: input, shape index: {}]   ;;  %s914_s7 = inlined_call_operand.hbm [shape: f32[16,128], index: 7, kind: output, shape index: {}]  }
   0x1   :  { %13 = vsyncpa [#allocation6], 0 }
   0x2   :  { %14 = vsyncpa [#allocation9], 0 }
   0x3   :  { %15 = vsyncpa [#allocation4], 0  ;;  %s731_s24 = smov [#allocation5]   ;;  %s732_s26 = smov [#allocation2]  }
   0x4   :  { %s33_s25 = sshll.u32 %s731_s24, 4  ;;  %s21_s27 = sshll.u32 %s732_s26, 4  ;;  %s34_s25 = int_to_ptr.vmem [resolvable:$true] %s33_s25  ;;  %s782_s27 = int_to_ptr.vmem [resolvable:$true] %s21_s27 }
   0x5   :  { %s613_s30 = scalar_lea.hbm %s908_s1, 1024 }
   0x6   :  { %p614_p0 = scmp.ne.s32.totalorder %s908_s1, %s613_s30  ;;  %p617_p1 = scmp.lt.u32.totalorder %s613_s30, %s908_s1 }
   0x8   :  { %p619_p2 = pnand %p617_p1, %p614_p0 }
   0xa   :  { %622 = shalt.err (!%p619_p2)
}
   0xb   :  { %s623_s12 = scalar_lea.vmem %s34_s25, 1024  ;;  %p628_p4 = scmp.lt.s32.totalorder %s34_s25, %s34_s25 }
   0xc   :  { %p624_p3 = scmp.ne.s32.totalorder %s34_s25, %s623_s12  ;;  %p629_p5 = scmp.lt.s32.totalorder %s623_s12, %s623_s12 }
   0xe   :  { %p630_p6 = por %p629_p5, %p628_p4 }
  0x10   :  { %p631_p7 = pnand %p630_p6, %p624_p3 }
  0x12   :  { %634 = shalt.err (!%p631_p7)
}
  0x13   :  { %s733_s13 = smov 64   ;;  %s734_s14 = smov 4  }
  0x14   :  { %39 = dma.hbm_to_vmem [thread:$0]  %s908_s1, 1024, %s34_s25, [#allocation6], %s733_s13, %s733_s13, %s734_s14  }
  0x15   :  { %s635_s19 = scalar_lea.hbm %s907_s0, 128 }
  0x16   :  { %p636_p8 = scmp.ne.s32.totalorder %s907_s0, %s635_s19  ;;  %p639_p9 = scmp.lt.u32.totalorder %s635_s19, %s907_s0 }
  0x18   :  { %p641_p10 = pnand %p639_p9, %p636_p8 }
  0x1a   :  { %644 = shalt.err (!%p641_p10)
}
  0x1b   :  { %s645_s24 = scalar_lea.vmem %s782_s27, 128  ;;  %p650_p12 = scmp.lt.s32.totalorder %s782_s27, %s782_s27 }
  0x1c   :  { %p646_p11 = scmp.ne.s32.totalorder %s782_s27, %s645_s24  ;;  %p651_p13 = scmp.lt.s32.totalorder %s645_s24, %s645_s24 }
  0x1e   :  { %p652_p0 = por %p651_p13, %p650_p12 }
  0x20   :  { %p653_p1 = pnand %p652_p0, %p646_p11 }
  0x22   :  { %656 = shalt.err (!%p653_p1)
}
  0x23   :  { %27 = dma.hbm_to_vmem [thread:$0]  %s907_s0, 128, %s782_s27, [#allocation3], %s733_s13, %s733_s13, %s734_s14  }
  0x24   :  { %s735_s26 = smov [#allocation7]   ;;  %s736_s29 = smov [#allocation8]  }
  0x25   :  { %s47_s28 = sshll.u32 %s735_s26, 4  ;;  %s61_s30 = sshll.u32 %s736_s29, 4  ;;  %s48_s28 = int_to_ptr.vmem [resolvable:$true] %s47_s28  ;;  %s819_s30 = int_to_ptr.vmem [resolvable:$true] %s61_s30 }
  0x26   :  { %s657_s10 = scalar_lea.hbm %s910_s3, 1024 }
  0x27   :  { %p658_p2 = scmp.ne.s32.totalorder %s910_s3, %s657_s10  ;;  %p661_p3 = scmp.lt.u32.totalorder %s657_s10, %s910_s3 }
  0x29   :  { %p663_p4 = pnand %p661_p3, %p658_p2 }
  0x2b   :  { %666 = shalt.err (!%p663_p4)
}
  0x2c   :  { %s667_s0 = scalar_lea.vmem %s48_s28, 1024  ;;  %p672_p6 = scmp.lt.s32.totalorder %s48_s28, %s48_s28 }
  0x2d   :  { %p668_p5 = scmp.ne.s32.totalorder %s48_s28, %s667_s0  ;;  %p673_p7 = scmp.lt.s32.totalorder %s667_s0, %s667_s0 }
  0x2f   :  { %p674_p8 = por %p673_p7, %p672_p6 }
  0x31   :  { %p675_p9 = pnand %p674_p8, %p668_p5 }
  0x33   :  { %678 = shalt.err (!%p675_p9)
}
  0x34   :  { %53 = dma.hbm_to_vmem [thread:$0]  %s910_s3, 1024, %s48_s28, [#allocation6], %s733_s13, %s733_s13, %s734_s14  }
  0x35   :  { %s679_s20 = scalar_lea.hbm %s912_s5, 1024 }
  0x36   :  { %p680_p10 = scmp.ne.s32.totalorder %s912_s5, %s679_s20  ;;  %p683_p11 = scmp.lt.u32.totalorder %s679_s20, %s912_s5 }
  0x38   :  { %p685_p12 = pnand %p683_p11, %p680_p10 }
  0x3a   :  { %688 = shalt.err (!%p685_p12)
}
  0x3b   :  { %s689_s1 = scalar_lea.vmem %s819_s30, 1024  ;;  %p694_p0 = scmp.lt.s32.totalorder %s819_s30, %s819_s30 }
  0x3c   :  { %p690_p13 = scmp.ne.s32.totalorder %s819_s30, %s689_s1  ;;  %p695_p1 = scmp.lt.s32.totalorder %s689_s1, %s689_s1 }
  0x3e   :  { %p696_p2 = por %p695_p1, %p694_p0 }
  0x40   :  { %p697_p3 = pnand %p696_p2, %p690_p13 }
  0x42   :  { %700 = shalt.err (!%p697_p3)
}
  0x43   :  { %67 = dma.hbm_to_vmem [thread:$0]  %s912_s5, 1024, %s819_s30, [#allocation9], %s733_s13, %s733_s13, %s734_s14  }
  0x44   :  { %723 = dma.done.wait [#allocation3], 128  }
  0x45   :  { %724 = vsyncadd [#allocation3], 4294967168 }
  0x46   :  { %725 = dma.done.wait [#allocation6], 2048  }
  0x47   :  { %726 = vsyncadd [#allocation6], 4294965248 }
  0x48   :  { %727 = dma.done.wait [#allocation9], 1024  }
  0x49   :  { %728 = vsyncadd [#allocation9], 4294966272  ;;  %v737_v0 = vmov 0.0   ;;  %vm738_vm0 = vmmov 0   ;;  %v584_v1 = vld [vmem:[#allocation5] sm:$0xff]   ;;  %v585_v2 = vld [vmem:[#allocation5 + $0x8] sm:$0xff]  }
  0x4a   :  { %513 = vmatprep.subr.bf16.mxu0 %v737_v0  ;;  %529 = vmatprep.mubr.msk.bf16.mxu0 %vm738_vm0, %v737_v0  ;;  %v586_v3 = vld [vmem:[#allocation5 + $0x10] sm:$0xff]   ;;  %v593_v4 = vld [vmem:[#allocation7] sm:$0xff]   ;;  %v587_v5 = vld [vmem:[#allocation5 + $0x18] sm:$0xff]  }
  0x4b   :  { %533 = vmatprep.subr.bf16.mxu1 %v737_v0  ;;  %549 = vmatprep.mubr.msk.bf16.mxu1 %vm738_vm0, %v737_v0  ;;  %v594_v6 = vld [vmem:[#allocation7 + $0x8] sm:$0xff]   ;;  %v588_v7 = vld [vmem:[#allocation5 + $0x20] sm:$0xff]   ;;  %v595_v8 = vld [vmem:[#allocation7 + $0x10] sm:$0xff]  }
  0x4c   :  { %514 = vmatpush3.bf16.msra.mxu0 %v584_v1  ;;  %534 = vmatpush3.bf16.msra.mxu1 %v593_v4  ;;  %v589_v9 = vld [vmem:[#allocation5 + $0x28] sm:$0xff]   ;;  %v596_v10 = vld [vmem:[#allocation7 + $0x18] sm:$0xff]   ;;  %v590_v11 = vld [vmem:[#allocation5 + $0x30] sm:$0xff]  }
  0x4d   :  { %515 = vmatprep.subr.bf16.mxu0 %v737_v0  ;;  %535 = vmatprep.subr.bf16.mxu1 %v737_v0  ;;  %v597_v12 = vld [vmem:[#allocation7 + $0x20] sm:$0xff]   ;;  %v591_v13 = vld [vmem:[#allocation5 + $0x38] sm:$0xff]   ;;  %v598_v14 = vld [vmem:[#allocation7 + $0x28] sm:$0xff]  }
  0x4e   :  { %v592_v15 = vld [vmem:[#allocation2] sm:$0xff]   ;;  %v599_v16 = vld [vmem:[#allocation7 + $0x30] sm:$0xff]   ;;  %v601_v18 = vld [vmem:[#allocation8] sm:$0xff]  }
  0x4f   :  { %v600_v17 = vld [vmem:[#allocation7 + $0x38] sm:$0xff]   ;;  %v602_v19 = vld [vmem:[#allocation8 + $0x8] sm:$0xff]   ;;  %v603_v20 = vld [vmem:[#allocation8 + $0x10] sm:$0xff]  }
  0x50   :  { %516 = vmatpush3.bf16.msra.mxu0 %v585_v2  ;;  %536 = vmatpush3.bf16.msra.mxu1 %v594_v6  ;;  %v604_v21 = vld [vmem:[#allocation8 + $0x18] sm:$0xff]   ;;  %v605_v22 = vld [vmem:[#allocation8 + $0x20] sm:$0xff]   ;;  %v606_v23 = vld [vmem:[#allocation8 + $0x28] sm:$0xff]  }
  0x51   :  { %517 = vmatprep.subr.bf16.mxu0 %v737_v0  ;;  %537 = vmatprep.subr.bf16.mxu1 %v737_v0  ;;  %v458_v24 = vld [vmem:[%s909_s2] ss:$0 sm:$0xff]  ;;  %v607_v34 = vld [vmem:[#allocation8 + $0x30] sm:$0xff]  }
  0x52   :  { %v608_v35 = vld [vmem:[#allocation8 + $0x38] sm:$0xff]  }
  0x53   :  { %v468_v36 = vld [vmem:[%s911_s4] ss:$0 sm:$0xff]  ;;  %s739_s4 = smov [#allocation10]  }
  0x54   :  { %518 = vmatpush3.bf16.msra.mxu0 %v586_v3  ;;  %538 = vmatpush3.bf16.msra.mxu1 %v595_v8  ;;  %v477_v46 = vld [vmem:[%s913_s6] ss:$0 sm:$0xff]  ;;  %s444_s29 = sshll.u32 %s739_s4, 4  ;;  %s445_s29 = int_to_ptr.vmem [resolvable:$true] %s444_s29 }
  0x55   :  { %519 = vmatprep.subr.bf16.mxu0 %v737_v0  ;;  %539 = vmatprep.subr.bf16.mxu1 %v737_v0  ;;  %s701_s30 = scalar_lea.vmem %s445_s29, 256  ;;  %p706_p5 = scmp.lt.s32.totalorder %s445_s29, %s445_s29 }
  0x56   :  { %p702_p4 = scmp.ne.s32.totalorder %s445_s29, %s701_s30  ;;  %p707_p6 = scmp.lt.s32.totalorder %s701_s30, %s701_s30 }
  0x58   :  { %520 = vmatpush3.bf16.msra.mxu0 %v587_v5  ;;  %540 = vmatpush3.bf16.msra.mxu1 %v596_v10  ;;  %p708_p7 = por %p707_p6, %p706_p5 }
  0x59   :  { %521 = vmatprep.subr.bf16.mxu0 %v737_v0  ;;  %541 = vmatprep.subr.bf16.mxu1 %v737_v0 }
  0x5a   :  { %p709_p8 = pnand %p708_p7, %p702_p4 }
  0x5c   :  { %522 = vmatpush3.bf16.msra.mxu0 %v588_v7  ;;  %542 = vmatpush3.bf16.msra.mxu1 %v597_v12 }
  0x5d   :  { %523 = vmatprep.subr.bf16.mxu0 %v737_v0  ;;  %543 = vmatprep.subr.bf16.mxu1 %v737_v0 }
  0x60   :  { %524 = vmatpush3.bf16.msra.mxu0 %v589_v9  ;;  %544 = vmatpush3.bf16.msra.mxu1 %v598_v14 }
  0x61   :  { %525 = vmatprep.subr.bf16.mxu0 %v737_v0  ;;  %545 = vmatprep.subr.bf16.mxu1 %v737_v0 }
  0x64   :  { %526 = vmatpush3.bf16.msra.mxu0 %v590_v11  ;;  %546 = vmatpush3.bf16.msra.mxu1 %v599_v16 }
  0x65   :  { %527 = vmatprep.subr.bf16.mxu0 %v737_v0  ;;  %547 = vmatprep.subr.bf16.mxu1 %v737_v0 }
  0x68   :  { %528 = vmatpush3.bf16.msra.mxu0 %v591_v13  ;;  %548 = vmatpush3.bf16.msra.mxu1 %v600_v17 }
  0x69   :  { %553 = vmatprep.subr.bf16.mxu0 %v737_v0 }
  0x6b   :  { %530 = vmatmul.mubr.bf16.vlgmr.msra.gmra.mrb[0].mxu0 %v592_v15 }
  0x6c   :  { %569 = vmatprep.mubr.msk.bf16.mxu0 %vm738_vm0, %v737_v0  ;;  %554 = vmatpush3.bf16.msra.mxu0 %v601_v18 }
  0x6d   :  { %555 = vmatprep.subr.bf16.mxu0 %v737_v0 }
  0x70   :  { %556 = vmatpush3.bf16.msra.mxu0 %v602_v19 }
  0x71   :  { %557 = vmatprep.subr.bf16.mxu0 %v737_v0 }
  0x74   :  { %558 = vmatpush3.bf16.msra.mxu0 %v603_v20 }
  0x75   :  { %559 = vmatprep.subr.bf16.mxu0 %v737_v0 }
  0x78   :  { %560 = vmatpush3.bf16.msra.mxu0 %v604_v21 }
  0x79   :  { %561 = vmatprep.subr.bf16.mxu0 %v737_v0 }
  0x7c   :  { %562 = vmatpush3.bf16.msra.mxu0 %v605_v22 }
  0x7d   :  { %563 = vmatprep.subr.bf16.mxu0 %v737_v0 }
  0x80   :  { %564 = vmatpush3.bf16.msra.mxu0 %v606_v23 }
  0x81   :  { %565 = vmatprep.subr.bf16.mxu0 %v737_v0 }
  0x84   :  { %566 = vmatpush3.bf16.msra.mxu0 %v607_v34 }
  0x85   :  { %567 = vmatprep.subr.bf16.mxu0 %v737_v0 }
  0x88   :  { %568 = vmatpush3.bf16.msra.mxu0 %v608_v35 }
 0x13e   :  { %v196_v25 = vpop.f32.mrb[0].mxu0 }
 0x13f   :  { %v197_v26 = vadd.f32 %v458_v24, %v196_v25  ;;  %v531_v27 = vpop.f32.mrb[1].mxu0 }
 0x140   :  { %v199_v28 = vpop.f32.mrb[2].mxu0 }
 0x141   :  { %v200_v29 = vadd.f32 %v458_v24, %v199_v28  ;;  %v532_v30 = vpop.f32.mrb[3].mxu0  ;;  %v203_v31 = vmax.f32 %v197_v26, 0.0 }
 0x143   :  { %v204_v32 = vmax.f32 %v200_v29, 0.0 }
 0x145   :  { %v205_v33 = vpack.c.bf16 %v204_v32, %v203_v31 }
 0x147   :  { %550 = vmatmul.mubr.bf16.vlgmr.msra.gmra.mrb[0].mxu1 %v205_v33 }
 0x21a   :  { %v311_v37 = vpop.f32.mrb[0].mxu1 }
 0x21b   :  { %v312_v38 = vadd.f32 %v468_v36, %v311_v37  ;;  %v551_v39 = vpop.f32.mrb[1].mxu1 }
 0x21c   :  { %v314_v40 = vpop.f32.mrb[2].mxu1 }
 0x21d   :  { %v315_v41 = vadd.f32 %v468_v36, %v314_v40  ;;  %v552_v42 = vpop.f32.mrb[3].mxu1  ;;  %v318_v43 = vmax.f32 %v312_v38, 0.0 }
 0x21f   :  { %v319_v44 = vmax.f32 %v315_v41, 0.0 }
 0x221   :  { %v320_v45 = vpack.c.bf16 %v319_v44, %v318_v43 }
 0x223   :  { %570 = vmatmul.mubr.bf16.vlgmr.msra.gmra.mrb[4].mxu0 %v320_v45 }
 0x2f6   :  { %v426_v47 = vpop.f32.mrb[4].mxu0 }
 0x2f7   :  { %v427_v48 = vadd.f32 %v477_v46, %v426_v47  ;;  %v571_v49 = vpop.f32.mrb[5].mxu0 }
 0x2f8   :  { %v429_v50 = vpop.f32.mrb[6].mxu0 }
 0x2f9   :  { %609 = vtanh.f32 %v427_v48  ;;  %v430_v51 = vadd.f32 %v477_v46, %v429_v50  ;;  %v572_v52 = vpop.f32.mrb[7].mxu0 }
 0x2fb   :  { %611 = vtanh.f32 %v430_v51 }
 0x303   :  { %v610_v53 = vpop.eup %609 }
 0x304   :  { %v435_v54 = vmul.f32 2.0, %v610_v53 }
 0x305   :  { %v612_v55 = vpop.eup %611 }
 0x306   :  { %437 = vst [vmem:[#allocation10] sm:$0xff] %v435_v54  ;;  %v436_v56 = vmul.f32 2.0, %v612_v55 }
 0x308   :  { %438 = vst [vmem:[#allocation10 + $0x8] sm:$0xff] %v436_v56 }
 0x309   :  { %712 = shalt.err (!%p709_p8)
}
 0x30a   :  { %s713_s9 = scalar_lea.hbm %s914_s7, 256 }
 0x30b   :  { %p714_p9 = scmp.ne.s32.totalorder %s914_s7, %s713_s9  ;;  %p717_p10 = scmp.lt.u32.totalorder %s713_s9, %s914_s7 }
 0x30d   :  { %p719_p11 = pnand %p717_p10, %p714_p9 }
 0x30f   :  { %722 = shalt.err (!%p719_p11)
}
 0x310   :  { %s740_s16 = smov 128   ;;  %s741_s0 = smov 8  }
 0x311   :  { %450 = dma.vmem_to_hbm [thread:$0]  %s445_s29, 256, %s914_s7, [#allocation4], %s740_s16, %s740_s16, %s741_s0  }
 0x312   :  { %729 = dma.done.wait [#allocation4], 256  }
 0x313   :  { %730 = vsyncadd [#allocation4], 4294967040 }
 0x314   :  { %454 = vsyncpa [#allocation3], 1 }
 0x315   :  { %455 = vsyncpa [#allocation6], 1 }
 0x316   :  { %456 = vsyncpa [#allocation9], 1 }
 0x317   :  { %457 = vsyncpa [#allocation4], 1 }

</bundles_post_ra>
